<compile_context>
chip_gen: v7x
topology: tpu7x:2x2x1
jax: 0.10.0
libtpu: 0.0.40
codegen_flags: <defaults>
</compile_context>

<pallas_src>
import jax
import jax.numpy as jnp
from jax.experimental import pallas as pl
from jax.experimental.pallas import tpu as pltpu  # noqa: F401  (TPU backend)


def relative_index_2d(dim: int) -> jnp.ndarray:
    """(dim*dim,) int32 with rel[i*dim + j] = i - j + dim - 1 (key - query)."""
    query_index = jnp.arange(dim, dtype=jnp.int32)[None, :]   # (1, dim) — j (query)
    key_index = jnp.arange(dim, dtype=jnp.int32)[:, None]     # (dim, 1) — i (key)
    rel = key_index - query_index + dim - 1                   # (dim, dim): i - j + dim - 1
    return rel.reshape(-1)


def _onehot_selection(dim: int) -> jnp.ndarray:
    """(L, N) 0/1 selection matrix as a bf16 (exact) trace-time constant."""
    L = 2 * dim - 1
    idx = relative_index_2d(dim)                               # (N,)
    lane = jnp.arange(L, dtype=jnp.int32)[:, None]             # (L, 1)
    return (lane == idx[None, :]).astype(jnp.bfloat16)         # (L, N)


def _rel_gather_kernel(rel_ref, sel_ref, q_ref, k_ref, v_ref):
    """Static gather expressed as one MXU matmul, then row-range stores.

    rel_ref: (C, L)  relative table, native dtype (cast to f32 in-kernel)
    sel_ref: (L, N)  bf16 0/1 selection matrix (static constant)
    q_ref:   (dim_kq, N), k_ref: (dim_kq, N), v_ref: (dim_v, N)  lane-dense.
    """
    rel = rel_ref[...].astype(jnp.float32)
    sel = sel_ref[...].astype(jnp.float32)   # exact: entries are 0/1
    flat = jnp.dot(rel, sel, preferred_element_type=jnp.float32)   # (C, N)
    dq = q_ref.shape[0]
    q_ref[...] = flat[:dq].astype(q_ref.dtype)
    k_ref[...] = flat[dq:2 * dq].astype(k_ref.dtype)
    v_ref[...] = flat[2 * dq:].astype(v_ref.dtype)


def relative_2d_pos_enc_qkv(relative, dim, dim_kq, dim_v, *, return_flat=False):
    """Pallas-backed forward pass of Relative2DPosEncQKV.

    Default (return_flat=False) matches the PyTorch module:
        q (dim_kq, dim, dim), k (dim_kq, dim, dim), v (dim_v, dim, dim)
    With return_flat=True, returns lane-dense slabs q/k (dim_kq, dim*dim) and
    v (dim_v, dim*dim) for fused consumers (avoids 16-wide masked accesses
    downstream).
    """
    C, L = relative.shape
    assert C == 2 * dim_kq + dim_v
    assert L == 2 * dim - 1
    N = dim * dim

    sel = _onehot_selection(dim)        # static bf16 constant, trace time
    out_dtype = relative.dtype

    in_bytes = relative.size * relative.dtype.itemsize + sel.size * sel.dtype.itemsize
    out_bytes = C * N * jnp.dtype(out_dtype).itemsize
    cost = pl.CostEstimate(
        flops=2 * C * L * N,
        transcendentals=0,
        bytes_accessed=in_bytes + out_bytes,
    )

    q_flat, k_flat, v_flat = pl.pallas_call(
        _rel_gather_kernel,
        out_shape=(
            jax.ShapeDtypeStruct((dim_kq, N), out_dtype),
            jax.ShapeDtypeStruct((dim_kq, N), out_dtype),
            jax.ShapeDtypeStruct((dim_v, N), out_dtype),
        ),
        in_specs=[
            pl.BlockSpec((C, L), lambda: (0, 0)),
            pl.BlockSpec((L, N), lambda: (0, 0)),
        ],
        out_specs=(
            pl.BlockSpec((dim_kq, N), lambda: (0, 0)),
            pl.BlockSpec((dim_kq, N), lambda: (0, 0)),
            pl.BlockSpec((dim_v, N), lambda: (0, 0)),
        ),
        cost_estimate=cost,
    )(relative, sel)

    if return_flat:
        return q_flat, k_flat, v_flat

    # Match the PyTorch 'c (x y) -> c x y' layout; this reshape is a bitcast
    # outside the kernel (the kernel stores stay lane-dense, N=dim*dim on lanes).
    return (
        q_flat.reshape(dim_kq, dim, dim),
        k_flat.reshape(dim_kq, dim, dim),
        v_flat.reshape(dim_v, dim, dim),
    )


if __name__ == "__main__":
    # Module hyperparameters (defaults of the PyTorch module).
    dim_head = 16     # dim
    dim_v = 16
    dim_kq = 8
    qkv_chan = 2 * dim_kq + dim_v            # 32
    table_len = 2 * dim_head - 1             # 31

    # Deterministic parameter init (stands in for torch.randn in __init__).
    key = jax.random.PRNGKey(0)
    relative = jax.random.normal(key, (qkv_chan, table_len), dtype=jnp.float32)

    q_emb, k_emb, v_emb = relative_2d_pos_enc_qkv(relative, dim_head, dim_kq, dim_v)
    jax.block_until_ready((q_emb, k_emb, v_emb))

    # Independently constructed reference index (straight from the PyTorch
    # formula key - query + dim - 1, without using the shared helper).
    idx_list = [i - j + dim_head - 1 for i in range(dim_head) for j in range(dim_head)]
    idx = jnp.asarray(idx_list, dtype=jnp.int32)
    assert jnp.array_equal(relative_index_2d(dim_head), idx)   # helper sanity

    ref = jnp.take(relative, idx, axis=1).reshape(qkv_chan, dim_head, dim_head)
    ref_q, ref_k, ref_v = ref[:dim_kq], ref[dim_kq:2 * dim_kq], ref[2 * dim_kq:]

    assert q_emb.shape == (dim_kq, dim_head, dim_head)
    assert k_emb.shape == (dim_kq, dim_head, dim_head)
    assert v_emb.shape == (dim_v, dim_head, dim_head)
    assert jnp.allclose(q_emb, ref_q, atol=1e-6)
    assert jnp.allclose(k_emb, ref_k, atol=1e-6)
    assert jnp.allclose(v_emb, ref_v, atol=1e-6)

    # Lane-dense variant is consistent with the reshaped one.
    qf, kf, vf = relative_2d_pos_enc_qkv(
        relative, dim_head, dim_kq, dim_v, return_flat=True
    )
    jax.block_until_ready((qf, kf, vf))
    assert jnp.array_equal(qf.reshape(dim_kq, dim_head, dim_head), q_emb)
    assert jnp.array_equal(kf.reshape(dim_kq, dim_head, dim_head), k_emb)
    assert jnp.array_equal(vf.reshape(dim_v, dim_head, dim_head), v_emb)

    print("KERNEL_OK")
</pallas_src>

<mosaic_0001>
module attributes {stable_mosaic.version = 11 : i64} {
  func.func @_rel_gather_kernel(%arg0: memref<32x31xf32, #tpu.memory_space<vmem>>, %arg1: memref<31x256xbf16, #tpu.memory_space<vmem>>, %arg2: memref<8x256xf32, #tpu.memory_space<vmem>>, %arg3: memref<8x256xf32, #tpu.memory_space<vmem>>, %arg4: memref<16x256xf32, #tpu.memory_space<vmem>>) attributes {dimension_semantics = [], scalar_prefetch = 0 : i64, scratch_operands = 0 : i64, tpu.core_type = #tpu.core_type<tc>} {
    %c0 = arith.constant 0 : index
    %c0_0 = arith.constant 0 : index
    %0 = vector.load %arg0[%c0, %c0_0] : memref<32x31xf32, #tpu.memory_space<vmem>>, vector<32x31xf32>
    %c0_1 = arith.constant 0 : index
    %c0_2 = arith.constant 0 : index
    %1 = vector.load %arg1[%c0_1, %c0_2] : memref<31x256xbf16, #tpu.memory_space<vmem>>, vector<31x256xbf16>
    %2 = arith.extf %1 : vector<31x256xbf16> to vector<31x256xf32>
    %cst = arith.constant dense<0.000000e+00> : vector<32x256xf32>
    %3 = tpu.matmul %0, %2, %cst {dimension_numbers = #tpu.dot_dimension_numbers<[1], [0], [0], [1], [0, 0, 1, 1], [], []>} : vector<32x31xf32>, vector<31x256xf32>, vector<32x256xf32> -> vector<32x256xf32>
    %4 = vector.extract_strided_slice %3 {offsets = [0, 0], sizes = [8, 256], strides = [1, 1]} : vector<32x256xf32> to vector<8x256xf32>
    %c0_3 = arith.constant 0 : index
    %c0_4 = arith.constant 0 : index
    %5 = vector.load %arg2[%c0_3, %c0_4] : memref<8x256xf32, #tpu.memory_space<vmem>>, vector<8x256xf32>
    tpu.vector_store %arg2[%c0_3, %c0_4], %4 {strides = array<i32>} : memref<8x256xf32, #tpu.memory_space<vmem>>, vector<8x256xf32>,
    %6 = vector.extract_strided_slice %3 {offsets = [8, 0], sizes = [8, 256], strides = [1, 1]} : vector<32x256xf32> to vector<8x256xf32>
    %c0_5 = arith.constant 0 : index
    %c0_6 = arith.constant 0 : index
    %7 = vector.load %arg3[%c0_5, %c0_6] : memref<8x256xf32, #tpu.memory_space<vmem>>, vector<8x256xf32>
    tpu.vector_store %arg3[%c0_5, %c0_6], %6 {strides = array<i32>} : memref<8x256xf32, #tpu.memory_space<vmem>>, vector<8x256xf32>,
    %8 = vector.extract_strided_slice %3 {offsets = [16, 0], sizes = [16, 256], strides = [1, 1]} : vector<32x256xf32> to vector<16x256xf32>
    %c0_7 = arith.constant 0 : index
    %c0_8 = arith.constant 0 : index
    %9 = vector.load %arg4[%c0_7, %c0_8] : memref<16x256xf32, #tpu.memory_space<vmem>>, vector<16x256xf32>
    tpu.vector_store %arg4[%c0_7, %c0_8], %8 {strides = array<i32>} : memref<16x256xf32, #tpu.memory_space<vmem>>, vector<16x256xf32>,
    return
  }
}

</mosaic_0001>

<bundles_post_ra>
// kernel: tpu_custom_call.1
= control target key start
LH: loop header
LB: loop body
LE: loop exit
PB: predicated region body
PF: predicated region fallthrough
CT: control target
= control target key end

     0   :  { %10 = vsyncpa [#allocation3], 0  ;;  %s484_s0 = inlined_call_operand.hbm [shape: f32[32,31], index: 0, kind: input, shape index: {}]   ;;  %s485_s1 = inlined_call_operand.hbm [shape: bf16[31,256], index: 1, kind: input, shape index: {}]   ;;  %s486_s2 = inlined_call_operand.hbm [shape: f32[8,256], index: 2, kind: output, shape index: {0}]   ;;  %s487_s3 = inlined_call_operand.hbm [shape: f32[8,256], index: 3, kind: output, shape index: {1}]   ;;  %s488_s4 = inlined_call_operand.hbm [shape: f32[16,256], index: 4, kind: output, shape index: {2}]  }
   0x1   :  { %11 = vsyncpa [#allocation6], 0 }
   0x2   :  { %12 = vsyncpa [#allocation4], 0 }
   0x3   :  { %13 = vsyncpa [#allocation9], 0  ;;  %s381_s15 = smov [#allocation2]   ;;  %s263_s19 = scalar_lea.hbm %s484_s0, 512 }
   0x4   :  { %s19_s16 = sshll.u32 %s381_s15, 4  ;;  %p264_p0 = scmp.ne.s32.totalorder %s484_s0, %s263_s19  ;;  %s20_s16 = int_to_ptr.vmem [resolvable:$true] %s19_s16 }
   0x5   :  { %p267_p1 = scmp.lt.u32.totalorder %s263_s19, %s484_s0 }
   0x7   :  { %p269_p2 = pnand %p267_p1, %p264_p0 }
   0x9   :  { %272 = shalt.err (!%p269_p2)
}
   0xa   :  { %s273_s24 = scalar_lea.vmem %s20_s16, 512  ;;  %p278_p4 = scmp.lt.s32.totalorder %s20_s16, %s20_s16 }
   0xb   :  { %p274_p3 = scmp.ne.s32.totalorder %s20_s16, %s273_s24  ;;  %p279_p5 = scmp.lt.s32.totalorder %s273_s24, %s273_s24 }
   0xd   :  { %p280_p6 = por %p279_p5, %p278_p4 }
   0xf   :  { %p281_p7 = pnand %p280_p6, %p274_p3 }
  0x11   :  { %284 = shalt.err (!%p281_p7)
}
  0x12   :  { %s382_s25 = smov 128   ;;  %s383_s26 = smov 8  }
  0x13   :  { %25 = dma.hbm_to_vmem [thread:$0]  %s484_s0, 512, %s20_s16, [#allocation3], %s382_s25, %s382_s25, %s383_s26  }
  0x14   :  { %s384_s29 = smov [#allocation5]   ;;  %s285_s7 = scalar_lea.hbm %s485_s1, 512 }
  0x15   :  { %s31_s30 = sshll.u32 %s384_s29, 4  ;;  %p286_p8 = scmp.ne.s32.totalorder %s485_s1, %s285_s7  ;;  %s32_s30 = int_to_ptr.vmem [resolvable:$true] %s31_s30 }
  0x16   :  { %p289_p9 = scmp.lt.u32.totalorder %s285_s7, %s485_s1 }
  0x18   :  { %p291_p10 = pnand %p289_p9, %p286_p8 }
  0x1a   :  { %294 = shalt.err (!%p291_p10)
}
  0x1b   :  { %s295_s12 = scalar_lea.vmem %s32_s30, 512  ;;  %p300_p12 = scmp.lt.s32.totalorder %s32_s30, %s32_s30 }
  0x1c   :  { %p296_p11 = scmp.ne.s32.totalorder %s32_s30, %s295_s12  ;;  %p301_p13 = scmp.lt.s32.totalorder %s295_s12, %s295_s12 }
  0x1e   :  { %p302_p0 = por %p301_p13, %p300_p12 }
  0x20   :  { %p303_p1 = pnand %p302_p0, %p296_p11 }
  0x22   :  { %306 = shalt.err (!%p303_p1)
}
  0x23   :  { %37 = dma.hbm_to_vmem [thread:$0]  %s485_s1, 512, %s32_s30, [#allocation6], %s382_s25, %s382_s25, %s383_s26  }
  0x24   :  { %373 = dma.done.wait [#allocation3], 512  }
  0x25   :  { %374 = vsyncadd [#allocation3], 4294966784 }
  0x26   :  { %375 = dma.done.wait [#allocation6], 512  }
  0x27   :  { %376 = vsyncadd [#allocation6], 4294966784  ;;  %v385_v0 = vmov 0.0   ;;  %vm73_vm0 = vcmask 1046528   ;;  %vm386_vm1 = vmmov 1   ;;  %v44_v5 = vld [vmem:[#allocation2] sm:$0xff] }
  0x28   :  { %144 = vmatprep.mubr.f32.mxu0 %v385_v0  ;;  %156 = vmatprep.mubr.f32.mxu1 %v385_v0  ;;  %vm233_vm2 = vmpackc.low %vm73_vm0, %vm386_vm1  ;;  %v257_v1 = vld [vmem:[#allocation5 + $0x4] ss:$8 sps:$4 sm:$0xff]   ;;  %v259_v2 = vld [vmem:[#allocation5] ss:$8 sps:$4 sm:$0xff]   ;;  %vm60_vm3 = vcmask 252928   ;;  %s387_s1 = smov [#allocation7]  }
  0x29   :  { %229 = vmatprep.subr.bf16.mxu0 %v257_v1  ;;  %238 = vmatprep.subr.bf16.mxu1 %v257_v1  ;;  %v260_v3 = vld [vmem:[#allocation5 + $0x14] ss:$8 sps:$4 sm:$0xff]   ;;  %v262_v4 = vld [vmem:[#allocation5 + $0x10] ss:$8 sps:$4 sm:$0xff]   ;;  %v45_v7 = vld [vmem:[#allocation2 + $0x8] sm:$0xff]  ;;  %s183_s14 = sshll.u32 %s387_s1, 4  ;;  %s184_s14 = int_to_ptr.vmem [resolvable:$true] %s183_s14 }
  0x2a   :  { %231 = vmatpush1.bf16.msra.mxu0 %v259_v2  ;;  %240 = vmatpush1.bf16.msra.mxu1 %v259_v2  ;;  %v46_v6 = vld [vmem:[#allocation2 + $0x10] sm:$0xff]  ;;  %v47_v8 = vld [vmem:[#allocation2 + $0x18] sm:$0xff]  ;;  %s388_s15 = smov [#allocation8]   ;;  %s389_s17 = smov [#allocation10]  }
  0x2b   :  { %234 = vmatprep.subr.msk.bf16.mxu0 %vm233_vm2, %v260_v3  ;;  %239 = vmatprep.subr.msk.bf16.mxu1 %vm233_vm2, %v260_v3  ;;  %s193_s16 = sshll.u32 %s388_s15, 4  ;;  %s202_s18 = sshll.u32 %s389_s17, 4  ;;  %s194_s16 = int_to_ptr.vmem [resolvable:$true] %s193_s16  ;;  %s453_s18 = int_to_ptr.vmem [resolvable:$true] %s202_s18 }
  0x2c   :  { %s307_s19 = scalar_lea.vmem %s184_s14, 256  ;;  %p312_p3 = scmp.lt.s32.totalorder %s184_s14, %s184_s14 }
  0x2d   :  { %p308_p2 = scmp.ne.s32.totalorder %s184_s14, %s307_s19  ;;  %p313_p4 = scmp.lt.s32.totalorder %s307_s19, %s307_s19 }
  0x2e   :  { %237 = vmatpush1.bf16.msk.msra.mxu0 %vm233_vm2, %v262_v4  ;;  %241 = vmatpush1.bf16.msk.msra.mxu1 %vm233_vm2, %v262_v4 }
  0x2f   :  { %p314_p5 = por %p313_p4, %p312_p3 }
  0x31   :  { %224 = vmatmul.mubr.msk.f32.vlgmr.msra.gmra.mrb[0].mxu0 %vm60_vm3, %v44_v5  ;;  %226 = vmatmul.mubr.msk.f32.vlgmr.msra.gmra.mrb[0].mxu1 %vm60_vm3, %v46_v6  ;;  %p315_p6 = pnand %p314_p5, %p308_p2 }
  0x32   :  { %150 = vmatprep.mubr.f32.mxu0 %v385_v0  ;;  %162 = vmatprep.mubr.f32.mxu1 %v385_v0 }
  0x35   :  { %225 = vmatmul.mubr.msk.f32.gmra.mrb[2].mxu0 %vm60_vm3, %v45_v7  ;;  %227 = vmatmul.mubr.msk.f32.gmra.mrb[2].mxu1 %vm60_vm3, %v47_v8 }
 0x104   :  { %v146_v9 = vpop.f32.mrb[0].mxu0  ;;  %v158_v10 = vpop.f32.mrb[0].mxu1 }
 0x105   :  { %169 = vst [vmem:[#allocation7] sm:$0xff] %v146_v9  ;;  %173 = vst [vmem:[#allocation10] sm:$0xff] %v158_v10  ;;  %v148_v11 = vpop.f32.mrb[1].mxu0  ;;  %v160_v12 = vpop.f32.mrb[1].mxu1 }
 0x106   :  { %170 = vst [vmem:[#allocation7 + $0x8] sm:$0xff] %v148_v11  ;;  %174 = vst [vmem:[#allocation10 + $0x8] sm:$0xff] %v160_v12 }
 0x107   :  { %318 = shalt.err (!%p315_p6)
}
 0x108   :  { %s319_s22 = scalar_lea.hbm %s486_s2, 256 }
 0x109   :  { %p320_p7 = scmp.ne.s32.totalorder %s486_s2, %s319_s22  ;;  %p323_p8 = scmp.lt.u32.totalorder %s319_s22, %s486_s2 }
 0x10b   :  { %p325_p9 = pnand %p323_p8, %p320_p7 }
 0x10d   :  { %328 = shalt.err (!%p325_p9)
}
 0x10e   :  { %186 = dma.vmem_to_hbm [thread:$0]  %s184_s14, 256, %s486_s2, [#allocation4]   ;;  %v152_v13 = vpop.f32.mrb[2].mxu0  ;;  %v164_v14 = vpop.f32.mrb[2].mxu1 }
 0x10f   :  { %171 = vst [vmem:[#allocation8] sm:$0xff] %v152_v13  ;;  %175 = vst [vmem:[#allocation10 + $0x10] sm:$0xff] %v164_v14  ;;  %v154_v15 = vpop.f32.mrb[3].mxu0  ;;  %v166_v16 = vpop.f32.mrb[3].mxu1  ;;  %s329_s29 = scalar_lea.vmem %s194_s16, 256  ;;  %p334_p11 = scmp.lt.s32.totalorder %s194_s16, %s194_s16 }
 0x110   :  { %172 = vst [vmem:[#allocation8 + $0x8] sm:$0xff] %v154_v15  ;;  %176 = vst [vmem:[#allocation10 + $0x18] sm:$0xff] %v166_v16  ;;  %p330_p10 = scmp.ne.s32.totalorder %s194_s16, %s329_s29  ;;  %p335_p12 = scmp.lt.s32.totalorder %s329_s29, %s329_s29 }
 0x112   :  { %p336_p13 = por %p335_p12, %p334_p11 }
 0x114   :  { %p337_p0 = pnand %p336_p13, %p330_p10 }
 0x116   :  { %340 = shalt.err (!%p337_p0)
}
 0x117   :  { %s341_s5 = scalar_lea.hbm %s487_s3, 256 }
 0x118   :  { %p342_p1 = scmp.ne.s32.totalorder %s487_s3, %s341_s5  ;;  %p345_p2 = scmp.lt.u32.totalorder %s341_s5, %s487_s3 }
 0x11a   :  { %p347_p3 = pnand %p345_p2, %p342_p1 }
 0x11c   :  { %350 = shalt.err (!%p347_p3)
}
 0x11d   :  { %196 = dma.vmem_to_hbm [thread:$0]  %s194_s16, 256, %s487_s3, [#allocation9]  }
 0x11e   :  { %s351_s12 = scalar_lea.vmem %s453_s18, 512  ;;  %p356_p5 = scmp.lt.s32.totalorder %s453_s18, %s453_s18 }
 0x11f   :  { %p352_p4 = scmp.ne.s32.totalorder %s453_s18, %s351_s12  ;;  %p357_p6 = scmp.lt.s32.totalorder %s351_s12, %s351_s12 }
 0x121   :  { %p358_p7 = por %p357_p6, %p356_p5 }
 0x123   :  { %p359_p8 = pnand %p358_p7, %p352_p4 }
 0x125   :  { %362 = shalt.err (!%p359_p8)
}
 0x126   :  { %s363_s1 = scalar_lea.hbm %s488_s4, 512 }
 0x127   :  { %p364_p9 = scmp.ne.s32.totalorder %s488_s4, %s363_s1  ;;  %p367_p10 = scmp.lt.u32.totalorder %s363_s1, %s488_s4 }
 0x129   :  { %p369_p11 = pnand %p367_p10, %p364_p9 }
 0x12b   :  { %372 = shalt.err (!%p369_p11)
}
 0x12c   :  { %s390_s3 = smov 256   ;;  %s391_s16 = smov 16  }
 0x12d   :  { %208 = dma.vmem_to_hbm [thread:$0]  %s453_s18, 512, %s488_s4, [#allocation9], %s390_s3, %s390_s3, %s391_s16  }
 0x12e   :  { %377 = dma.done.wait [#allocation4], 256  }
 0x12f   :  { %378 = vsyncadd [#allocation4], 4294967040 }
 0x130   :  { %379 = dma.done.wait [#allocation9], 768  }
 0x131   :  { %380 = vsyncadd [#allocation9], 4294966528 }
 0x132   :  { %218 = vsyncpa [#allocation3], 1 }
 0x133   :  { %219 = vsyncpa [#allocation6], 1 }
 0x134   :  { %220 = vsyncpa [#allocation4], 1 }
 0x135   :  { %221 = vsyncpa [#allocation9], 1 }

</bundles_post_ra>
